<compile_context>
chip_gen: v7x
topology: tpu7x:2x2x1
jax: 0.10.0
libtpu: 0.0.40
codegen_flags: <defaults>
</compile_context>

<pallas_src>
import functools

import jax
import jax.numpy as jnp
from jax.experimental import pallas as pl
from jax.experimental.pallas import tpu as pltpu


def _round_up(x: int, m: int) -> int:
    return ((x + m - 1) // m) * m


# --------------------------------------------------------------------------
# Kernel: one token tile through fc1 -> ReLU -> fc2 (drop=0.0 is identity).
# --------------------------------------------------------------------------
def _mlp_kernel(x_ref, w1_ref, b1_ref, w2_ref, b2_ref, o_ref):
    # fc1: (TM, cin_g) @ (cin_g, h_g), f32 accumulation on the MXU.
    h = jnp.dot(x_ref[...], w1_ref[...], preferred_element_type=jnp.float32)
    # Bias (broadcast of the (1, h_g) row) + ReLU in f32 on the VPU.
    h = jnp.maximum(h + b1_ref[...], 0.0)
    # dropout(p=0.0) is the identity -> skipped.
    # TODO(synk): dropout with p > 0 (training mode) is not implemented.
    # fc2: (TM, h_g) @ (h_g, cout_g), f32 accumulation.  With bf16 weights the
    # hidden activation is downcast to bf16 (standard mixed precision).
    out = jnp.dot(h.astype(w2_ref.dtype), w2_ref[...],
                  preferred_element_type=jnp.float32)
    o_ref[...] = (out + b2_ref[...]).astype(o_ref.dtype)


# --------------------------------------------------------------------------
# One-off weight preprocessing (hoisted out of the forward path).
# --------------------------------------------------------------------------
def pack_mlp_params(w1, b1, w2, b2):
    """Pack Mlp weights for the lane-dense kernel.  Call ONCE per layer.

    Input layout: w1 (Cin, H), b1 (H,), w2 (H, Cout), b2 (Cout,).
    Returns (packed_arrays, static_meta) for mlp_forward_packed.
    """
    Cin, H = w1.shape
    H2, Cout = w2.shape
    assert H2 == H, "w1/w2 hidden dims disagree"

    # ---- token-grouping factor g and channel pads so every HBM-facing last
    #      dim is a multiple of 128 (unmasked vld/vst is the biggest layout
    #      lever; ~4.5x on narrow stores).
    if Cin % 128 == 0:
        g, cin_p = 1, Cin
    elif 128 % Cin == 0:
        g, cin_p = 128 // Cin, Cin                # pack g tokens per row
    else:
        g, cin_p = 1, _round_up(Cin, 128)         # pad channel axis to 128
    cout_p = _round_up(Cout, 128 // g)            # g * cout_p % 128 == 0
    hp = _round_up(H, max(8, 128 // g))           # g * hp lane aligned

    # ---- zero pads are exact: relu(x @ 0 + 0) = 0 contributes nothing
    #      through the zero-padded rows of w2.
    w1p = jnp.pad(w1, ((0, cin_p - Cin), (0, hp - H)))
    b1p = jnp.pad(b1, ((0, hp - H),))
    w2p = jnp.pad(w2, ((0, hp - H), (0, cout_p - Cout)))
    b2p = jnp.pad(b2, ((0, cout_p - Cout),))

    # ---- block-diagonal expansion so g consecutive tokens share one row
    #      (tiny, one-off; done here so it never re-executes per forward).
    if g > 1:
        eye = jnp.eye(g, dtype=w1p.dtype)
        w1p = jnp.kron(eye, w1p)                  # (g*cin_p, g*hp)
        w2p = jnp.kron(eye, w2p)                  # (g*hp,   g*cout_p)
        b1p = jnp.tile(b1p, g)
        b2p = jnp.tile(b2p, g)

    packed = (w1p, b1p.reshape(1, -1), w2p, b2p.reshape(1, -1))
    meta = dict(g=g, cin=Cin, cin_p=cin_p, cout=Cout, cout_p=cout_p)
    return packed, meta


# --------------------------------------------------------------------------
# Forward pass.
# --------------------------------------------------------------------------
@functools.partial(jax.jit,
                   static_argnames=("g", "cin", "cin_p", "cout", "cout_p", "tm"))
def mlp_forward_packed(x, w1p, b1p, w2p, b2p, *,
                       g, cin, cin_p, cout, cout_p, tm=2048):
    """x: (B, N, Cin) -> (B, N, Cout). Matches torch Mlp.forward (drop=0.0).

    Feed bf16 x and bf16 packed weights on v5e/v6e/v7x for ~2x less HBM
    traffic (this kernel is HBM-bound at ESRT widths); accumulation and the
    bias+ReLU math stay in f32 either way.
    """
    B, N, Cin = x.shape
    assert Cin == cin, "x channel dim does not match packed weights"
    tokens = B * N

    x2 = x.reshape(tokens, Cin)                   # contiguous -> free reshape
    if cin_p != Cin:                              # channel pad (Cin not a 128 divisor/multiple)
        x2 = jnp.pad(x2, ((0, 0), (0, cin_p - Cin)))

    tg = pl.cdiv(tokens, g)
    tpad = tg * g - tokens
    if tpad:                                      # pad token axis to a multiple of g
        x2 = jnp.pad(x2, ((0, tpad), (0, 0)))

    cin_g = cin_p * g
    h_g = w1p.shape[1]
    cout_g = w2p.shape[1]
    x2 = x2.reshape(tg, cin_g)                    # g tokens per 128+-lane row

    # ---- token tile: big (>=512 rows gets ~85% of HBM roofline), clamped to
    #      the token extent, auto-shrunk to a v7x-safe VMEM budget.
    w_itemsize = w1p.dtype.itemsize
    x_itemsize = x2.dtype.itemsize
    wbytes = (w1p.size + b1p.size + w2p.size + b2p.size) * w_itemsize

    def vmem_est(t):
        return (2 * t * (cin_g + cout_g) * x_itemsize   # double-buffered x/out tiles
                + 2 * wbytes                            # resident weights/biases
                + t * (h_g + cout_g) * 4)               # f32 intermediates

    VMEM_BUDGET = 40 * 1024 * 1024                # headroom under v7x 64 MiB/TC
    tm_eff = min(tm, tg)
    while tm_eff > 128 and vmem_est(tm_eff) > VMEM_BUDGET:
        tm_eff = (tm_eff + 1) // 2
    if tm_eff < tg:                               # partial tiles: sublane-align
        tm_eff = max(8, (tm_eff // 8) * 8)
    est = vmem_est(tm_eff)
    assert est <= VMEM_BUDGET, (
        f"MLP tiles need ~{est >> 20} MiB VMEM; reduce tm or channel packing")
    vmem_limit = int(min(max(2 * est, 32 * 1024 * 1024), 56 * 1024 * 1024))

    grid = (pl.cdiv(tg, tm_eff),)

    out = pl.pallas_call(
        _mlp_kernel,
        out_shape=jax.ShapeDtypeStruct((tg, cout_g), x.dtype),
        grid_spec=pltpu.PrefetchScalarGridSpec(
            num_scalar_prefetch=0,
            grid=grid,
            in_specs=[
                pl.BlockSpec((tm_eff, cin_g), lambda i: (i, 0)),   # x tile
                # Constant index_maps -> fetched once, VMEM-resident across
                # the whole token grid.  (On v7x with large channels, add
                # pipeline_mode=pl.Buffered(1) here to single-buffer them.)
                pl.BlockSpec((cin_g, h_g), lambda i: (0, 0)),      # w1
                pl.BlockSpec((1, h_g), lambda i: (0, 0)),          # b1
                pl.BlockSpec((h_g, cout_g), lambda i: (0, 0)),     # w2
                pl.BlockSpec((1, cout_g), lambda i: (0, 0)),       # b2
            ],
            out_specs=pl.BlockSpec((tm_eff, cout_g), lambda i: (i, 0)),
        ),
        compiler_params=pltpu.CompilerParams(
            # Token axis is fully independent -> shard grid steps across the
            # two v7x TensorCores; no-op on single-core v5e/v6e.
            dimension_semantics=("parallel",),
            vmem_limit_bytes=vmem_limit),
    )(x2, w1p, b1p, w2p, b2p)

    # ---- unpack: (tg, g*cout_p) -> per-token rows, drop token/channel pads.
    out = out.reshape(tg * g, cout_p)
    if tpad:
        out = out[:tokens]
    if cout_p != cout:
        out = out[:, :cout]
    return out.reshape(B, N, cout)


def init_mlp_params(key, in_features, hidden_features=None, out_features=None,
                    dtype=jnp.float32):
    """Deterministic init mimicking nn.Linear defaults (uniform +-1/sqrt(fan_in)).
    Returns weights already transposed to (in, out) layout."""
    out_features = out_features or in_features
    hidden_features = hidden_features or in_features // 4
    k1, k2, k3, k4 = jax.random.split(key, 4)
    bound1 = 1.0 / (in_features ** 0.5)
    bound2 = 1.0 / (hidden_features ** 0.5)
    w1 = jax.random.uniform(k1, (in_features, hidden_features), dtype,
                            minval=-bound1, maxval=bound1)
    b1 = jax.random.uniform(k2, (hidden_features,), dtype,
                            minval=-bound1, maxval=bound1)
    w2 = jax.random.uniform(k3, (hidden_features, out_features), dtype,
                            minval=-bound2, maxval=bound2)
    b2 = jax.random.uniform(k4, (out_features,), dtype,
                            minval=-bound2, maxval=bound2)
    return w1, b1, w2, b2


if __name__ == "__main__":
    key = jax.random.PRNGKey(0)
    kx, kp = jax.random.split(key)

    B, N, Cin = 2, 8, 32          # batch=2, seq=8, in_features=32
    # hidden_features defaults to in_features // 4 = 8, out_features = 32
    w1, b1, w2, b2 = init_mlp_params(kp, Cin)
    Cout = w2.shape[1]
    x = jax.random.normal(kx, (B, N, Cin), dtype=jnp.float32)

    # Pure-JAX reference (same semantics as the torch module in eval mode).
    ref = jnp.maximum(x @ w1 + b1, 0.0) @ w2 + b2

    # ---- f32 path ----------------------------------------------------------
    packed, meta = pack_mlp_params(w1, b1, w2, b2)          # once per layer
    out = mlp_forward_packed(x, *packed, **meta)
    out = jax.block_until_ready(out)
    assert out.shape == (B, N, Cout)
    assert jnp.allclose(out, ref, atol=1e-5, rtol=1e-5), "f32 mismatch vs reference"

    # ---- bf16 I/O path (recommended on v5e/v6e/v7x: halves HBM traffic) ----
    packed_bf, meta_bf = pack_mlp_params(*(p.astype(jnp.bfloat16)
                                           for p in (w1, b1, w2, b2)))
    out_bf = mlp_forward_packed(x.astype(jnp.bfloat16), *packed_bf, **meta_bf)
    out_bf = jax.block_until_ready(out_bf)
    assert out_bf.dtype == jnp.bfloat16
    assert jnp.allclose(out_bf.astype(jnp.float32), ref, atol=5e-2, rtol=5e-2), \
        "bf16 mismatch vs reference"

    print("KERNEL_OK")
</pallas_src>

<mosaic_0001>
module attributes {stable_mosaic.version = 11 : i64} {
  func.func @_mlp_kernel(%arg0: i32, %arg1: memref<4x128xf32, #tpu.memory_space<vmem>>, %arg2: memref<128x128xf32, #tpu.memory_space<vmem>>, %arg3: memref<1x128xf32, #tpu.memory_space<vmem>>, %arg4: memref<128x128xf32, #tpu.memory_space<vmem>>, %arg5: memref<1x128xf32, #tpu.memory_space<vmem>>, %arg6: memref<4x128xf32, #tpu.memory_space<vmem>>) attributes {dimension_semantics = [#tpu.dimension_semantics<parallel>], iteration_bounds = array<i64: 1>, scalar_prefetch = 0 : i64, scratch_operands = 0 : i64, tpu.core_type = #tpu.core_type<tc>, window_params = [{transform_indices = @transform_0, window_bounds = array<i64: 4, 128>}, {pipeline_mode = #tpu.pipeline_mode<synchronous>, transform_indices = @transform_1, window_bounds = array<i64: 128, 128>}, {pipeline_mode = #tpu.pipeline_mode<synchronous>, transform_indices = @transform_2, window_bounds = array<i64: 1, 128>}, {pipeline_mode = #tpu.pipeline_mode<synchronous>, transform_indices = @transform_3, window_bounds = array<i64: 128, 128>}, {pipeline_mode = #tpu.pipeline_mode<synchronous>, transform_indices = @transform_4, window_bounds = array<i64: 1, 128>}, {transform_indices = @transform_5, window_bounds = array<i64: 4, 128>}]} {
    %c0 = arith.constant 0 : index
    %c0_0 = arith.constant 0 : index
    %0 = vector.load %arg1[%c0, %c0_0] : memref<4x128xf32, #tpu.memory_space<vmem>>, vector<4x128xf32>
    %c0_1 = arith.constant 0 : index
    %c0_2 = arith.constant 0 : index
    %1 = vector.load %arg2[%c0_1, %c0_2] : memref<128x128xf32, #tpu.memory_space<vmem>>, vector<128x128xf32>
    %cst = arith.constant dense<0.000000e+00> : vector<4x128xf32>
    %2 = tpu.matmul %0, %1, %cst {dimension_numbers = #tpu.dot_dimension_numbers<[1], [0], [0], [1], [0, 0, 1, 1], [], []>} : vector<4x128xf32>, vector<128x128xf32>, vector<4x128xf32> -> vector<4x128xf32>
    %c0_3 = arith.constant 0 : index
    %c0_4 = arith.constant 0 : index
    %3 = vector.load %arg3[%c0_3, %c0_4] : memref<1x128xf32, #tpu.memory_space<vmem>>, vector<1x128xf32>
    %4 = vector.broadcast %3 : vector<1x128xf32> to vector<4x128xf32>
    %5 = arith.addf %2, %4 : vector<4x128xf32>
    %cst_5 = arith.constant 0.000000e+00 : f32
    %6 = vector.broadcast %cst_5 : f32 to vector<4x128xf32>
    %7 = arith.maximumf %5, %6 : vector<4x128xf32>
    %c0_6 = arith.constant 0 : index
    %c0_7 = arith.constant 0 : index
    %8 = vector.load %arg4[%c0_6, %c0_7] : memref<128x128xf32, #tpu.memory_space<vmem>>, vector<128x128xf32>
    %cst_8 = arith.constant dense<0.000000e+00> : vector<4x128xf32>
    %9 = tpu.matmul %7, %8, %cst_8 {dimension_numbers = #tpu.dot_dimension_numbers<[1], [0], [0], [1], [0, 0, 1, 1], [], []>} : vector<4x128xf32>, vector<128x128xf32>, vector<4x128xf32> -> vector<4x128xf32>
    %c0_9 = arith.constant 0 : index
    %c0_10 = arith.constant 0 : index
    %10 = vector.load %arg5[%c0_9, %c0_10] : memref<1x128xf32, #tpu.memory_space<vmem>>, vector<1x128xf32>
    %11 = vector.broadcast %10 : vector<1x128xf32> to vector<4x128xf32>
    %12 = arith.addf %9, %11 : vector<4x128xf32>
    %c0_11 = arith.constant 0 : index
    %c0_12 = arith.constant 0 : index
    %13 = vector.load %arg6[%c0_11, %c0_12] : memref<4x128xf32, #tpu.memory_space<vmem>>, vector<4x128xf32>
    tpu.vector_store %arg6[%c0_11, %c0_12], %12 {strides = array<i32>} : memref<4x128xf32, #tpu.memory_space<vmem>>, vector<4x128xf32>,
    return
  }
  func.func @transform_0(%arg0: i32) -> (i32, i32) {
    %c0_i32 = arith.constant 0 : i32
    %c0_i32_0 = arith.constant 0 : i32
    return %arg0, %c0_i32 : i32, i32
  }
  func.func @transform_1(%arg0: i32) -> (i32, i32) {
    %c0_i32 = arith.constant 0 : i32
    %c0_i32_0 = arith.constant 0 : i32
    %c0_i32_1 = arith.constant 0 : i32
    return %c0_i32, %c0_i32_0 : i32, i32
  }
  func.func @transform_2(%arg0: i32) -> (i32, i32) {
    %c0_i32 = arith.constant 0 : i32
    %c0_i32_0 = arith.constant 0 : i32
    %c0_i32_1 = arith.constant 0 : i32
    return %c0_i32, %c0_i32_0 : i32, i32
  }
  func.func @transform_3(%arg0: i32) -> (i32, i32) {
    %c0_i32 = arith.constant 0 : i32
    %c0_i32_0 = arith.constant 0 : i32
    %c0_i32_1 = arith.constant 0 : i32
    return %c0_i32, %c0_i32_0 : i32, i32
  }
  func.func @transform_4(%arg0: i32) -> (i32, i32) {
    %c0_i32 = arith.constant 0 : i32
    %c0_i32_0 = arith.constant 0 : i32
    %c0_i32_1 = arith.constant 0 : i32
    return %c0_i32, %c0_i32_0 : i32, i32
  }
  func.func @transform_5(%arg0: i32) -> (i32, i32) {
    %c0_i32 = arith.constant 0 : i32
    %c0_i32_0 = arith.constant 0 : i32
    return %arg0, %c0_i32 : i32, i32
  }
}

</mosaic_0001>

<bundles_post_ra>
// kernel: mlp_forward_packed.1
= control target key start
LH: loop header
LB: loop body
LE: loop exit
PB: predicated region body
PF: predicated region fallthrough
CT: control target
= control target key end

     0   :  { %10 = vsyncpa [#allocation3], 0  ;;  %s541_s0 = inlined_call_operand.vmem [shape: f32[4,128], index: 0, kind: input, shape index: {}]   ;;  %s542_s1 = inlined_call_operand.hbm [shape: f32[128,128], index: 1, kind: input, shape index: {}]   ;;  %s543_s2 = inlined_call_operand.vmem [shape: f32[1,128], index: 2, kind: input, shape index: {}]   ;;  %s544_s3 = inlined_call_operand.hbm [shape: f32[128,128], index: 3, kind: input, shape index: {}]   ;;  %s545_s4 = inlined_call_operand.vmem [shape: f32[1,128], index: 4, kind: input, shape index: {}]   ;;  %s546_s5 = inlined_call_operand.vmem [shape: f32[4,128], index: 5, kind: output, shape index: {}]  }
   0x1   :  { %11 = vsyncpa [#allocation5], 0  ;;  %s452_s18 = smov [#allocation2]   ;;  %s404_s22 = scalar_lea.hbm %s542_s1, 2048 }
   0x2   :  { %s19_s19 = sshll.u32 %s452_s18, 4  ;;  %p405_p0 = scmp.ne.s32.totalorder %s542_s1, %s404_s22  ;;  %s20_s19 = int_to_ptr.vmem [resolvable:$true] %s19_s19 }
   0x3   :  { %p408_p1 = scmp.lt.u32.totalorder %s404_s22, %s542_s1 }
   0x5   :  { %p410_p2 = pnand %p408_p1, %p405_p0 }
   0x7   :  { %413 = shalt.err (!%p410_p2)
}
   0x8   :  { %s414_s27 = scalar_lea.vmem %s20_s19, 2048  ;;  %p419_p4 = scmp.lt.s32.totalorder %s20_s19, %s20_s19 }
   0x9   :  { %p415_p3 = scmp.ne.s32.totalorder %s20_s19, %s414_s27  ;;  %p420_p5 = scmp.lt.s32.totalorder %s414_s27, %s414_s27 }
   0xb   :  { %p421_p6 = por %p420_p5, %p419_p4 }
   0xd   :  { %p422_p7 = pnand %p421_p6, %p415_p3 }
   0xf   :  { %425 = shalt.err (!%p422_p7)
}
  0x10   :  { %s453_s28 = smov 128   ;;  %s454_s29 = smov 8  }
  0x11   :  { %25 = dma.hbm_to_vmem [thread:$0]  %s542_s1, 2048, %s20_s19, [#allocation3], %s453_s28, %s453_s28, %s454_s29  }
  0x12   :  { %s455_s7 = smov [#allocation4]   ;;  %s426_s11 = scalar_lea.hbm %s544_s3, 2048 }
  0x13   :  { %s33_s8 = sshll.u32 %s455_s7, 4  ;;  %p427_p8 = scmp.ne.s32.totalorder %s544_s3, %s426_s11  ;;  %s34_s8 = int_to_ptr.vmem [resolvable:$true] %s33_s8 }
  0x14   :  { %p430_p9 = scmp.lt.u32.totalorder %s426_s11, %s544_s3 }
  0x16   :  { %p432_p10 = pnand %p430_p9, %p427_p8 }
  0x18   :  { %435 = shalt.err (!%p432_p10)
}
  0x19   :  { %s436_s16 = scalar_lea.vmem %s34_s8, 2048  ;;  %p441_p12 = scmp.lt.s32.totalorder %s34_s8, %s34_s8 }
  0x1a   :  { %p437_p11 = scmp.ne.s32.totalorder %s34_s8, %s436_s16  ;;  %p442_p13 = scmp.lt.s32.totalorder %s436_s16, %s436_s16 }
  0x1c   :  { %p443_p0 = por %p442_p13, %p441_p12 }
  0x1e   :  { %p444_p1 = pnand %p443_p0, %p437_p11 }
  0x20   :  { %447 = shalt.err (!%p444_p1)
}
  0x21   :  { %39 = dma.hbm_to_vmem [thread:$0]  %s544_s3, 2048, %s34_s8, [#allocation5], %s453_s28, %s453_s28, %s454_s29  }
  0x22   :  { %448 = dma.done.wait [#allocation3], 2048  }
  0x23   :  { %449 = vsyncadd [#allocation3], 4294965248 }
  0x24   :  { %450 = dma.done.wait [#allocation5], 2048  }
  0x25   :  { %451 = vsyncadd [#allocation5], 4294965248  ;;  %v456_v0 = vmov 0.0|0.0   ;;  %vm457_vm0 = vmmov 0   ;;  %v458_v1 = vmov 0.0   ;;  %v49_v2 = vld [vmem:[#allocation2] sm:$0xff] }
  0x26   :  { %349 = vmatprep.subr.bf16.mxu0 %v456_v0  ;;  %311 = vmatprep.mubr.msk.f32.mxu0 %vm457_vm0, %v458_v1  ;;  %v50_v3 = vld [vmem:[#allocation2 + $0x8] sm:$0xff]  ;;  %v51_v4 = vld [vmem:[#allocation2 + $0x10] sm:$0xff]  ;;  %v52_v6 = vld [vmem:[#allocation2 + $0x18] sm:$0xff] }
  0x27   :  { %373 = vmatprep.subr.bf16.mxu1 %v456_v0  ;;  %346 = vmatprep.mubr.msk.f32.mxu1 %vm457_vm0, %v458_v1  ;;  %v350_v5 = vpack.c.bf16 %v50_v3, %v49_v2  ;;  %v353_v7 = vpack.c.bf16 %v52_v6, %v51_v4  ;;  %v53_v8 = vld [vmem:[#allocation2 + $0x20] sm:$0xff]  ;;  %v54_v9 = vld [vmem:[#allocation2 + $0x28] sm:$0xff]  ;;  %v145_v12 = vld [vmem:[#allocation4 + $0x10] sm:$0xff] }
  0x28   :  { %v143_v10 = vld [vmem:[#allocation4] sm:$0xff]  ;;  %v144_v11 = vld [vmem:[#allocation4 + $0x8] sm:$0xff]  ;;  %v146_v13 = vld [vmem:[#allocation4 + $0x18] sm:$0xff]  ;;  %v356_v14 = vpack.c.bf16 %v54_v9, %v53_v8 }
  0x29   :  { %351 = vmatpush3.bf16.msra.mxu0 %v350_v5  ;;  %v374_v15 = vpack.c.bf16 %v144_v11, %v143_v10  ;;  %v55_v16 = vld [vmem:[#allocation2 + $0x30] sm:$0xff]  ;;  %v56_v17 = vld [vmem:[#allocation2 + $0x38] sm:$0xff]  ;;  %v377_v18 = vpack.c.bf16 %v146_v13, %v145_v12  ;;  %v147_v19 = vld [vmem:[#allocation4 + $0x20] sm:$0xff] }
  0x2a   :  { %352 = vmatprep.subr.bf16.mxu0 %v456_v0  ;;  %v148_v20 = vld [vmem:[#allocation4 + $0x28] sm:$0xff]  ;;  %v359_v21 = vpack.c.bf16 %v56_v17, %v55_v16  ;;  %v57_v22 = vld [vmem:[#allocation2 + $0x40] sm:$0xff]  ;;  %v149_v25 = vld [vmem:[#allocation4 + $0x30] sm:$0xff] }
  0x2b   :  { %375 = vmatpush3.bf16.msra.mxu1 %v374_v15  ;;  %v58_v23 = vld [vmem:[#allocation2 + $0x48] sm:$0xff]  ;;  %v380_v24 = vpack.c.bf16 %v148_v20, %v147_v19  ;;  %v150_v26 = vld [vmem:[#allocation4 + $0x38] sm:$0xff]  ;;  %v59_v28 = vld [vmem:[#allocation2 + $0x50] sm:$0xff] }
  0x2c   :  { %376 = vmatprep.subr.bf16.mxu1 %v456_v0  ;;  %v362_v27 = vpack.c.bf16 %v58_v23, %v57_v22  ;;  %v60_v29 = vld [vmem:[#allocation2 + $0x58] sm:$0xff]  ;;  %v383_v30 = vpack.c.bf16 %v150_v26, %v149_v25  ;;  %v151_v31 = vld [vmem:[#allocation4 + $0x40] sm:$0xff]  ;;  %v152_v32 = vld [vmem:[#allocation4 + $0x48] sm:$0xff] }
  0x2d   :  { %354 = vmatpush3.bf16.msra.mxu0 %v353_v7  ;;  %v365_v33 = vpack.c.bf16 %v60_v29, %v59_v28  ;;  %v61_v34 = vld [vmem:[#allocation2 + $0x60] sm:$0xff]  ;;  %v62_v35 = vld [vmem:[#allocation2 + $0x68] sm:$0xff]  ;;  %v386_v36 = vpack.c.bf16 %v152_v32, %v151_v31  ;;  %v153_v37 = vld [vmem:[#allocation4 + $0x50] sm:$0xff] }
  0x2e   :  { %355 = vmatprep.subr.bf16.mxu0 %v456_v0  ;;  %v154_v38 = vld [vmem:[#allocation4 + $0x58] sm:$0xff]  ;;  %v368_v39 = vpack.c.bf16 %v62_v35, %v61_v34  ;;  %v63_v40 = vld [vmem:[#allocation2 + $0x70] sm:$0xff]  ;;  %v155_v43 = vld [vmem:[#allocation4 + $0x60] sm:$0xff] }
  0x2f   :  { %378 = vmatpush3.bf16.msra.mxu1 %v377_v18  ;;  %v64_v41 = vld [vmem:[#allocation2 + $0x78] sm:$0xff]  ;;  %v389_v42 = vpack.c.bf16 %v154_v38, %v153_v37  ;;  %v156_v44 = vld [vmem:[#allocation4 + $0x68] sm:$0xff]  ;;  %v48_v47 = vld [vmem:[%s541_s0] sm:$0xf] }
  0x30   :  { %379 = vmatprep.subr.bf16.mxu1 %v456_v0  ;;  %v371_v45 = vpack.c.bf16 %v64_v41, %v63_v40  ;;  %v392_v46 = vpack.c.bf16 %v156_v44, %v155_v43  ;;  %v157_v48 = vld [vmem:[#allocation4 + $0x70] sm:$0xff]  ;;  %v158_v49 = vld [vmem:[#allocation4 + $0x78] sm:$0xff]  ;;  %v243_v51 = vld [vmem:[%s543_s2] ss:$0 sm:$0xff] }
  0x31   :  { %357 = vmatpush3.bf16.msra.mxu0 %v356_v14  ;;  %v395_v50 = vpack.c.bf16 %v158_v49, %v157_v48  ;;  %v244_v56 = vld [vmem:[%s545_s4] ss:$0 sm:$0xff] }
  0x32   :  { %358 = vmatprep.subr.bf16.mxu0 %v456_v0 }
  0x33   :  { %381 = vmatpush3.bf16.msra.mxu1 %v380_v24 }
  0x34   :  { %382 = vmatprep.subr.bf16.mxu1 %v456_v0 }
  0x35   :  { %360 = vmatpush3.bf16.msra.mxu0 %v359_v21 }
  0x36   :  { %361 = vmatprep.subr.bf16.mxu0 %v456_v0 }
  0x37   :  { %384 = vmatpush3.bf16.msra.mxu1 %v383_v30 }
  0x38   :  { %385 = vmatprep.subr.bf16.mxu1 %v456_v0 }
  0x39   :  { %363 = vmatpush3.bf16.msra.mxu0 %v362_v27 }
  0x3a   :  { %364 = vmatprep.subr.bf16.mxu0 %v456_v0 }
  0x3b   :  { %387 = vmatpush3.bf16.msra.mxu1 %v386_v36 }
  0x3c   :  { %388 = vmatprep.subr.bf16.mxu1 %v456_v0 }
  0x3d   :  { %366 = vmatpush3.bf16.msra.mxu0 %v365_v33 }
  0x3e   :  { %367 = vmatprep.subr.bf16.mxu0 %v456_v0 }
  0x3f   :  { %390 = vmatpush3.bf16.msra.mxu1 %v389_v42 }
  0x40   :  { %391 = vmatprep.subr.bf16.mxu1 %v456_v0 }
  0x41   :  { %369 = vmatpush3.bf16.msra.mxu0 %v368_v39 }
  0x42   :  { %370 = vmatprep.subr.bf16.mxu0 %v456_v0 }
  0x43   :  { %393 = vmatpush3.bf16.msra.mxu1 %v392_v46 }
  0x44   :  { %394 = vmatprep.subr.bf16.mxu1 %v456_v0 }
  0x45   :  { %372 = vmatpush3.bf16.msra.mxu0 %v371_v45 }
  0x47   :  { %396 = vmatpush3.bf16.msra.mxu1 %v395_v50 }
  0x48   :  { %312 = vmatmul.mubr.f32.vlgmr.msra.gmra.mrb[0].mxu0 %v48_v47 }
 0x11b   :  { %v138_v52 = vpop.f32.mrb[0].mxu0 }
 0x11c   :  { %v139_v53 = vadd.f32 %v243_v51, %v138_v52  ;;  %v313_v54 = vpop.f32.mrb[1].mxu0 }
 0x11e   :  { %v142_v55 = vmax.f32 %v139_v53, 0.0 }
 0x120   :  { %347 = vmatmul.mubr.f32.vlgmr.msra.gmra.mrb[0].mxu1 %v142_v55 }
 0x1f3   :  { %v232_v57 = vpop.f32.mrb[0].mxu1 }
 0x1f4   :  { %v233_v58 = vadd.f32 %v244_v56, %v232_v57  ;;  %v348_v59 = vpop.f32.mrb[1].mxu1 }
 0x1f6   :  { %236 = vst [vmem:[%s546_s5] sm:$0xf] %v233_v58 }
 0x1f7   :  { %241 = vsyncpa [#allocation3], 1 }
 0x1f8   :  { %242 = vsyncpa [#allocation5], 1 }

</bundles_post_ra>
